<compile_context>
chip_gen: v5e
topology: v5e:2x2
jax: 0.10.0
libtpu: 0.0.40
codegen_flags: <defaults>
</compile_context>

<pallas_src>
import jax
import jax.numpy as jnp
from jax.experimental import pallas as pl
from jax.experimental.pallas import tpu as pltpu

IN_FEATURES = 10
OUT_FEATURES = 2
LANE = 128                    # TPU lane width
MAX_TB = 32768                # batch-tile size on the lane axis (~1.5 MB/buf)
SMALL_BATCH_CUTOFF = 128      # below this, fused XLA beats any custom call


def linear_add_kernel(w_ref, b10_ref, xt_ref, o_ref):
    """o = w @ x^T + (b + 10), lane-dense over the batch.

    w_ref  : VMEM (OUT, IN)   weight tile
    b10_ref: VMEM (OUT, 1)    bias with the +10 constant pre-folded
    xt_ref : VMEM (IN, TB)    x transposed -> batch on the lane axis
    o_ref  : VMEM (OUT, TB)   lane-dense output (full-width stores)
    """
    o_ref[...] = (
        jnp.dot(w_ref[...], xt_ref[...], preferred_element_type=jnp.float32)
        + b10_ref[...]
    )


def _round_up(n, m):
    return -(-n // m) * m


def _tiling(batch):
    """Pick (tile, padded_batch) for the lane-dense batch axis."""
    b128 = _round_up(max(batch, 1), LANE)
    tb = min(MAX_TB, b128)
    # v7x has 2 TensorCores: for sizeable batches keep >= 2 grid steps so the
    # "parallel" batch axis can be sharded across both cores.  (On v5e/v6e a
    # single big tile would be equally fine.)
    if b128 >= 4 * LANE and b128 // tb < 2:
        tb = _round_up(b128 // 2, LANE)
    b_pad = _round_up(b128, tb)
    return tb, b_pad


def model_forward_pallas(x, w, b):
    """Pallas path. x: (B, 10), w: (2, 10), b: (2,) -> (B, 2) f32."""
    B = x.shape[0]
    # Fold "+10" into the bias once, at parameter-prep time.
    b10 = (b.astype(jnp.float32) + 10.0).reshape(OUT_FEATURES, 1)
    w2d = w.astype(jnp.float32).reshape(OUT_FEATURES, IN_FEATURES)

    tb, b_pad = _tiling(B)
    # One fused pad+transpose pass over x (no zeros-init + scatter).
    xt = jnp.pad(x.astype(jnp.float32), ((0, b_pad - B), (0, 0))).T  # (IN, b_pad)

    cost = pl.CostEstimate(
        flops=2 * IN_FEATURES * OUT_FEATURES * b_pad,
        transcendentals=0,
        bytes_accessed=4 * ((IN_FEATURES + OUT_FEATURES) * b_pad
                            + OUT_FEATURES * IN_FEATURES + OUT_FEATURES),
    )

    out_t = pl.pallas_call(
        linear_add_kernel,
        out_shape=jax.ShapeDtypeStruct((OUT_FEATURES, b_pad), jnp.float32),
        grid=(b_pad // tb,),
        in_specs=[
            pl.BlockSpec((OUT_FEATURES, IN_FEATURES), lambda i: (0, 0)),  # w
            pl.BlockSpec((OUT_FEATURES, 1), lambda i: (0, 0)),            # b + 10
            pl.BlockSpec((IN_FEATURES, tb), lambda i: (0, i)),            # x^T tile
        ],
        out_specs=pl.BlockSpec((OUT_FEATURES, tb), lambda i: (0, i)),
        compiler_params=pltpu.CompilerParams(
            dimension_semantics=("parallel",)),
        cost_estimate=cost,
    )(w2d, b10, xt)

    return out_t[:, :B].T                              # back to (B, OUT)


def model_forward(x, w, b):
    """Matches the PyTorch module: self.linear(x) + 10.

    For tiny batches (the module's literal use-case, B=1) a single fused XLA
    op is strictly faster than any custom call; the Pallas kernel handles
    large batched calls.
    """
    if x.shape[0] <= SMALL_BATCH_CUTOFF:
        return (x.astype(jnp.float32) @ w.astype(jnp.float32).T
                + (b.astype(jnp.float32) + 10.0))
    return model_forward_pallas(x, w, b)


if __name__ == "__main__":
    key = jax.random.PRNGKey(0)
    kx, kw, kb, kx2 = jax.random.split(key, 4)

    # Deterministic Linear(10, 2) params (PyTorch-style uniform init).
    bound = 1.0 / (IN_FEATURES ** 0.5)
    w = jax.random.uniform(kw, (OUT_FEATURES, IN_FEATURES), jnp.float32, -bound, bound)
    b = jax.random.uniform(kb, (OUT_FEATURES,), jnp.float32, -bound, bound)

    # --- exercise the Pallas kernel directly (small batch, forced path) ---
    B = 8
    x = jax.random.normal(kx, (B, IN_FEATURES), dtype=jnp.float32)
    fwd_pallas = jax.jit(model_forward_pallas)
    out = jax.block_until_ready(fwd_pallas(x, w, b))
    ref = x @ w.T + b + 10.0
    assert out.shape == (B, OUT_FEATURES)
    assert jnp.allclose(out, ref, atol=1e-5, rtol=1e-5)

    # --- exercise batch padding / masking of the padded columns ---
    B2 = 200
    x2 = jax.random.normal(kx2, (B2, IN_FEATURES), dtype=jnp.float32)
    out2 = jax.block_until_ready(fwd_pallas(x2, w, b))
    ref2 = x2 @ w.T + b + 10.0
    assert out2.shape == (B2, OUT_FEATURES)
    assert jnp.allclose(out2, ref2, atol=1e-5, rtol=1e-5)

    # --- the dispatcher's tiny-batch XLA fast path (module's literal case) ---
    out3 = jax.block_until_ready(jax.jit(model_forward)(x[:1], w, b))
    assert jnp.allclose(out3, ref[:1], atol=1e-5, rtol=1e-5)

    print("KERNEL_OK")
</pallas_src>

<mosaic_0001>
module attributes {stable_mosaic.version = 11 : i64} {
  func.func @linear_add_kernel(%arg0: i32, %arg1: memref<2x10xf32, #tpu.memory_space<vmem>>, %arg2: memref<2x1xf32, #tpu.memory_space<vmem>>, %arg3: memref<10x128xf32, #tpu.memory_space<vmem>>, %arg4: memref<2x128xf32, #tpu.memory_space<vmem>>) attributes {dimension_semantics = [#tpu.dimension_semantics<parallel>], iteration_bounds = array<i64: 1>, scalar_prefetch = 0 : i64, scratch_operands = 0 : i64, tpu.core_type = #tpu.core_type<tc>, window_params = [{pipeline_mode = #tpu.pipeline_mode<synchronous>, transform_indices = @transform_0, window_bounds = array<i64: 2, 10>}, {pipeline_mode = #tpu.pipeline_mode<synchronous>, transform_indices = @transform_1, window_bounds = array<i64: 2, 1>}, {transform_indices = @transform_2, window_bounds = array<i64: 10, 128>}, {transform_indices = @transform_3, window_bounds = array<i64: 2, 128>}]} {
    %c0 = arith.constant 0 : index
    %c0_0 = arith.constant 0 : index
    %0 = vector.load %arg1[%c0, %c0_0] : memref<2x10xf32, #tpu.memory_space<vmem>>, vector<2x10xf32>
    %c0_1 = arith.constant 0 : index
    %c0_2 = arith.constant 0 : index
    %1 = vector.load %arg3[%c0_1, %c0_2] : memref<10x128xf32, #tpu.memory_space<vmem>>, vector<10x128xf32>
    %cst = arith.constant dense<0.000000e+00> : vector<2x128xf32>
    %2 = tpu.matmul %0, %1, %cst {dimension_numbers = #tpu.dot_dimension_numbers<[1], [0], [0], [1], [0, 0, 1, 1], [], []>} : vector<2x10xf32>, vector<10x128xf32>, vector<2x128xf32> -> vector<2x128xf32>
    %c0_3 = arith.constant 0 : index
    %c0_4 = arith.constant 0 : index
    %3 = vector.load %arg2[%c0_3, %c0_4] : memref<2x1xf32, #tpu.memory_space<vmem>>, vector<2x1xf32>
    %4 = vector.broadcast %3 : vector<2x1xf32> to vector<2x128xf32>
    %5 = arith.addf %2, %4 : vector<2x128xf32>
    %c0_5 = arith.constant 0 : index
    %c0_6 = arith.constant 0 : index
    %6 = vector.load %arg4[%c0_5, %c0_6] : memref<2x128xf32, #tpu.memory_space<vmem>>, vector<2x128xf32>
    tpu.vector_store %arg4[%c0_5, %c0_6], %5 {strides = array<i32>} : memref<2x128xf32, #tpu.memory_space<vmem>>, vector<2x128xf32>,
    return
  }
  func.func @transform_0(%arg0: i32) -> (i32, i32) {
    %c0_i32 = arith.constant 0 : i32
    %c0_i32_0 = arith.constant 0 : i32
    %c0_i32_1 = arith.constant 0 : i32
    return %c0_i32, %c0_i32_0 : i32, i32
  }
  func.func @transform_1(%arg0: i32) -> (i32, i32) {
    %c0_i32 = arith.constant 0 : i32
    %c0_i32_0 = arith.constant 0 : i32
    %c0_i32_1 = arith.constant 0 : i32
    return %c0_i32, %c0_i32_0 : i32, i32
  }
  func.func @transform_2(%arg0: i32) -> (i32, i32) {
    %c0_i32 = arith.constant 0 : i32
    %c0_i32_0 = arith.constant 0 : i32
    return %c0_i32, %arg0 : i32, i32
  }
  func.func @transform_3(%arg0: i32) -> (i32, i32) {
    %c0_i32 = arith.constant 0 : i32
    %c0_i32_0 = arith.constant 0 : i32
    return %c0_i32, %arg0 : i32, i32
  }
}

</mosaic_0001>

<bundles_post_ra>
// kernel: model_forward_pallas.1
= control target key start
LH: loop header
LB: loop body
LE: loop exit
PB: predicated region body
PF: predicated region fallthrough
CT: control target
= control target key end

     0   :  { %vm27_vm0 = vcmask 1041408   ;;  %v60_v2 = vmov 0   ;;  %vm23_vm1 = vcmask 80896   ;;  %s96_s2 = inlined_call_operand.vmem [shape: f32[10,128], index: 2, kind: input, shape index: {}]   ;;  %s97_s0 = inlined_call_operand.vmem [shape: f32[2,10], index: 0, kind: input, shape index: {}]   ;;  %s98_s1 = inlined_call_operand.vmem [shape: f32[2,1], index: 1, kind: input, shape index: {}]   ;;  %s99_s3 = inlined_call_operand.vmem [shape: f32[2,128], index: 3, kind: output, shape index: {}]  }
   0x1   :  { %v16_v0 = vld [vmem:[%s96_s2 + $0x8] sm:$0x3]  ;;  %v15_v1 = vld [vmem:[%s96_s2] sm:$0xff]  ;;  %59 = vset.pattern.permute.xlu0 %v60_v2 }
   0x2   :  { %56 = vmatpush.msk.msra.mxu0 %vm27_vm0, %v16_v0  ;;  %v14_v3 = vld [vmem:[%s97_s0] sm:$0x3] }
   0x3   :  { %v17_v4 = vld [vmem:[%s98_s1] sm:$0x3] }
   0x4   :  { %20 = vperm.xlu0 %59, %v17_v4   ;;  %46 = vmatpush.msra.mxu0 %v15_v1 }
   0x5   :  { %57 = vmatmul.msk.f32.vlgmr.msra.gmra.mxu0 %vm23_vm1, %v14_v3 }
  0x76   :  { %v21_v5 = vpop.permute.xlu0 %20 }
  0x82   :  { %v48_v6 = vpop.f32.mrf.mxu0 }
  0x83   :  { %v49_v7 = vadd.f32 %v48_v6, %v21_v5 }
  0x85   :  { %51 = vst [vmem:[%s99_s3] sm:$0x3] %v49_v7 }

</bundles_post_ra>
